<compile_context>
chip_gen: v5e
topology: v5e:2x2
jax: 0.10.0
libtpu: 0.0.40
codegen_flags: <defaults>
</compile_context>

<pallas_src>
import jax
import jax.numpy as jnp
from jax.experimental import pallas as pl
from jax.experimental.pallas import tpu as pltpu

HIDDEN_DIM = 128
INPUT_DIM = 28
LAYER_DIM = 1   # single RNN layer (matches module config)
OUTPUT_DIM = 10


def rnn_fc_kernel(x_ref, wih_ref, whh_ref, b_ref, wfc_ref, bfc_ref, out_ref):
    """Single invocation: full RNN unroll + final fc.

    x_ref   : [B, T, D_in]  whole input, batch-first, resident in VMEM (f32)
    wih_ref : [D_in, H]     W_ih^T (f32)
    whh_ref : [H, H]        W_hh^T (bf16, MXU-native)
    b_ref   : [1, H]        pre-fused b_ih + b_hh (f32)
    wfc_ref : [H, O]        fc weight^T (f32)
    bfc_ref : [1, O]        fc bias (f32)
    out_ref : [B, O]
    """
    x = x_ref[...]                       # [B, T, D] — tiny, a few vregs
    B, T, D = x.shape
    H = whh_ref.shape[1]

    # ---- Loop-invariant work, hoisted off the recurrent critical path ----
    # One M = B*T matmul (better MXU fill than T tiny M=B matmuls) and a
    # single bias broadcast (JAX does not CSE broadcast_in_dim across the
    # static unroll, so do it exactly once here).
    xw = (jnp.dot(x.reshape(B * T, D), wih_ref[...],
                  preferred_element_type=jnp.float32)
          .reshape(B, T, H)
          + b_ref[...])                  # [B, T, H], f32

    whh = whh_ref[...]                   # bf16, loop-invariant, vreg-resident

    # ---- Serial recurrence: only h @ W_hh stays on the dependent chain ----
    if T == 0:
        h = jnp.zeros((B, H), jnp.float32)
    else:
        # h_{-1} == 0 (nn.RNN(x, None)) -> step 0 is just relu(x0 W_ih + b).
        h = jnp.maximum(xw[:, 0, :], 0.0)
        for t in range(1, T):
            pre = (jnp.dot(h.astype(jnp.bfloat16), whh,
                           preferred_element_type=jnp.float32)
                   + xw[:, t, :])
            h = jnp.maximum(pre, 0.0)    # nonlinearity='relu'

    # fc1 on the last timestep's hidden state.
    out_ref[...] = (jnp.dot(h, wfc_ref[...], preferred_element_type=jnp.float32)
                    + bfc_ref[...]).astype(out_ref.dtype)


def rnnimc_forward(x, params):
    """x: [B, T, D_in] float32 (batch_first, like the PyTorch module)."""
    B, T, D = x.shape
    O = params["w_fc_t"].shape[1]

    return pl.pallas_call(
        rnn_fc_kernel,
        out_shape=jax.ShapeDtypeStruct((B, O), jnp.float32),
        # No grid: everything (~100 KB total) sits in VMEM for the whole call;
        # any grid would only add ~0.35 us/step pipeline overhead.
        in_specs=[pl.BlockSpec(memory_space=pltpu.MemorySpace.VMEM)] * 6,
        out_specs=pl.BlockSpec(memory_space=pltpu.MemorySpace.VMEM),
    )(x, params["w_ih_t"], params["w_hh_t"], params["b"],
      params["w_fc_t"], params["b_fc"])


def init_params(key, input_dim=INPUT_DIM, hidden_dim=HIDDEN_DIM,
                output_dim=OUTPUT_DIM):
    """Deterministic init mirroring PyTorch's U(-1/sqrt(H), 1/sqrt(H)).

    Weights stored pre-transposed so the kernel does plain x @ W; the two
    recurrent biases are fused here (exact), and W_hh is stored bf16.
    """
    k = jax.random.split(key, 6)
    s = 1.0 / jnp.sqrt(hidden_dim)
    w_ih_t = jax.random.uniform(k[0], (input_dim, hidden_dim),
                                jnp.float32, -s, s)
    w_hh_t = jax.random.uniform(k[1], (hidden_dim, hidden_dim),
                                jnp.float32, -s, s)
    b_ih = jax.random.uniform(k[2], (1, hidden_dim), jnp.float32, -s, s)
    b_hh = jax.random.uniform(k[3], (1, hidden_dim), jnp.float32, -s, s)
    w_fc_t = jax.random.uniform(k[4], (hidden_dim, output_dim),
                                jnp.float32, -s, s)
    b_fc = jax.random.uniform(k[5], (1, output_dim), jnp.float32, -s, s)
    return {
        "w_ih_t": w_ih_t,
        "w_hh_t": w_hh_t.astype(jnp.bfloat16),   # MXU-native recurrent weight
        "b": b_ih + b_hh,                        # fused once at init time
        "w_fc_t": w_fc_t,
        "b_fc": b_fc,
    }


def rnnimc_reference(x, params):
    """Pure-JAX reference mirroring the kernel's math (bf16 W_hh, f32 accum)."""
    B, T, D = x.shape
    H = params["w_hh_t"].shape[0]
    xw = (jnp.dot(x.reshape(B * T, D), params["w_ih_t"],
                  preferred_element_type=jnp.float32)
          .reshape(B, T, H) + params["b"])
    h = jnp.zeros((B, H), jnp.float32)
    for t in range(T):
        h = jnp.maximum(
            jnp.dot(h.astype(jnp.bfloat16), params["w_hh_t"],
                    preferred_element_type=jnp.float32) + xw[:, t, :],
            0.0)
    return (jnp.dot(h, params["w_fc_t"], preferred_element_type=jnp.float32)
            + params["b_fc"])


if __name__ == "__main__":
    key = jax.random.PRNGKey(0)
    k_param, k_x = jax.random.split(key)

    batch = 2
    time_step = 8   # time_step = total_pixels / input_dim in the original use
    x = jax.random.normal(k_x, (batch, time_step, INPUT_DIM), jnp.float32)

    params = init_params(k_param)

    out = rnnimc_forward(x, params)
    out = jax.block_until_ready(out)

    ref = rnnimc_reference(x, params)
    assert out.shape == (batch, OUTPUT_DIM)
    # Tolerance loosened for bf16 recurrent weights (reference uses the same
    # bf16 math, but off-chain f32 matmul precision may differ slightly).
    assert jnp.allclose(out, ref, atol=2e-2, rtol=2e-2)

    print("KERNEL_OK")
</pallas_src>

<mosaic_0001>
module attributes {stable_mosaic.version = 11 : i64} {
  func.func @rnn_fc_kernel(%arg0: memref<2x8x28xf32, #tpu.memory_space<vmem>>, %arg1: memref<28x128xf32, #tpu.memory_space<vmem>>, %arg2: memref<128x128xbf16, #tpu.memory_space<vmem>>, %arg3: memref<1x128xf32, #tpu.memory_space<vmem>>, %arg4: memref<128x10xf32, #tpu.memory_space<vmem>>, %arg5: memref<1x10xf32, #tpu.memory_space<vmem>>, %arg6: memref<2x10xf32, #tpu.memory_space<vmem>>) attributes {dimension_semantics = [], scalar_prefetch = 0 : i64, scratch_operands = 0 : i64, tpu.core_type = #tpu.core_type<tc>} {
    %c0 = arith.constant 0 : index
    %c0_0 = arith.constant 0 : index
    %c0_1 = arith.constant 0 : index
    %0 = vector.load %arg0[%c0, %c0_0, %c0_1] : memref<2x8x28xf32, #tpu.memory_space<vmem>>, vector<2x8x28xf32>
    %1 = vector.shape_cast %0 : vector<2x8x28xf32> to vector<16x28xf32>
    %c0_2 = arith.constant 0 : index
    %c0_3 = arith.constant 0 : index
    %2 = vector.load %arg1[%c0_2, %c0_3] : memref<28x128xf32, #tpu.memory_space<vmem>>, vector<28x128xf32>
    %cst = arith.constant dense<0.000000e+00> : vector<16x128xf32>
    %3 = tpu.matmul %1, %2, %cst {dimension_numbers = #tpu.dot_dimension_numbers<[1], [0], [0], [1], [0, 0, 1, 1], [], []>} : vector<16x28xf32>, vector<28x128xf32>, vector<16x128xf32> -> vector<16x128xf32>
    %4 = vector.shape_cast %3 : vector<16x128xf32> to vector<2x8x128xf32>
    %c0_4 = arith.constant 0 : index
    %c0_5 = arith.constant 0 : index
    %5 = vector.load %arg3[%c0_4, %c0_5] : memref<1x128xf32, #tpu.memory_space<vmem>>, vector<1x128xf32>
    %6 = vector.shape_cast %5 : vector<1x128xf32> to vector<1x1x128xf32>
    %7 = vector.broadcast %6 : vector<1x1x128xf32> to vector<2x8x128xf32>
    %8 = arith.addf %4, %7 : vector<2x8x128xf32>
    %c0_6 = arith.constant 0 : index
    %c0_7 = arith.constant 0 : index
    %9 = vector.load %arg2[%c0_6, %c0_7] : memref<128x128xbf16, #tpu.memory_space<vmem>>, vector<128x128xbf16>
    %10 = vector.extract_strided_slice %8 {offsets = [0, 0, 0], sizes = [2, 1, 128], strides = [1, 1, 1]} : vector<2x8x128xf32> to vector<2x1x128xf32>
    %11 = vector.shape_cast %10 : vector<2x1x128xf32> to vector<2x128xf32>
    %cst_8 = arith.constant 0.000000e+00 : f32
    %12 = vector.broadcast %cst_8 : f32 to vector<2x128xf32>
    %13 = arith.maximumf %11, %12 : vector<2x128xf32>
    %14 = arith.truncf %13 : vector<2x128xf32> to vector<2x128xbf16>
    %cst_9 = arith.constant dense<0.000000e+00> : vector<2x128xf32>
    %15 = tpu.matmul %14, %9, %cst_9 {dimension_numbers = #tpu.dot_dimension_numbers<[1], [0], [0], [1], [0, 0, 1, 1], [], []>} : vector<2x128xbf16>, vector<128x128xbf16>, vector<2x128xf32> -> vector<2x128xf32>
    %16 = vector.extract_strided_slice %8 {offsets = [0, 1, 0], sizes = [2, 1, 128], strides = [1, 1, 1]} : vector<2x8x128xf32> to vector<2x1x128xf32>
    %17 = vector.shape_cast %16 : vector<2x1x128xf32> to vector<2x128xf32>
    %18 = arith.addf %15, %17 : vector<2x128xf32>
    %cst_10 = arith.constant 0.000000e+00 : f32
    %19 = vector.broadcast %cst_10 : f32 to vector<2x128xf32>
    %20 = arith.maximumf %18, %19 : vector<2x128xf32>
    %21 = arith.truncf %20 : vector<2x128xf32> to vector<2x128xbf16>
    %cst_11 = arith.constant dense<0.000000e+00> : vector<2x128xf32>
    %22 = tpu.matmul %21, %9, %cst_11 {dimension_numbers = #tpu.dot_dimension_numbers<[1], [0], [0], [1], [0, 0, 1, 1], [], []>} : vector<2x128xbf16>, vector<128x128xbf16>, vector<2x128xf32> -> vector<2x128xf32>
    %23 = vector.extract_strided_slice %8 {offsets = [0, 2, 0], sizes = [2, 1, 128], strides = [1, 1, 1]} : vector<2x8x128xf32> to vector<2x1x128xf32>
    %24 = vector.shape_cast %23 : vector<2x1x128xf32> to vector<2x128xf32>
    %25 = arith.addf %22, %24 : vector<2x128xf32>
    %cst_12 = arith.constant 0.000000e+00 : f32
    %26 = vector.broadcast %cst_12 : f32 to vector<2x128xf32>
    %27 = arith.maximumf %25, %26 : vector<2x128xf32>
    %28 = arith.truncf %27 : vector<2x128xf32> to vector<2x128xbf16>
    %cst_13 = arith.constant dense<0.000000e+00> : vector<2x128xf32>
    %29 = tpu.matmul %28, %9, %cst_13 {dimension_numbers = #tpu.dot_dimension_numbers<[1], [0], [0], [1], [0, 0, 1, 1], [], []>} : vector<2x128xbf16>, vector<128x128xbf16>, vector<2x128xf32> -> vector<2x128xf32>
    %30 = vector.extract_strided_slice %8 {offsets = [0, 3, 0], sizes = [2, 1, 128], strides = [1, 1, 1]} : vector<2x8x128xf32> to vector<2x1x128xf32>
    %31 = vector.shape_cast %30 : vector<2x1x128xf32> to vector<2x128xf32>
    %32 = arith.addf %29, %31 : vector<2x128xf32>
    %cst_14 = arith.constant 0.000000e+00 : f32
    %33 = vector.broadcast %cst_14 : f32 to vector<2x128xf32>
    %34 = arith.maximumf %32, %33 : vector<2x128xf32>
    %35 = arith.truncf %34 : vector<2x128xf32> to vector<2x128xbf16>
    %cst_15 = arith.constant dense<0.000000e+00> : vector<2x128xf32>
    %36 = tpu.matmul %35, %9, %cst_15 {dimension_numbers = #tpu.dot_dimension_numbers<[1], [0], [0], [1], [0, 0, 1, 1], [], []>} : vector<2x128xbf16>, vector<128x128xbf16>, vector<2x128xf32> -> vector<2x128xf32>
    %37 = vector.extract_strided_slice %8 {offsets = [0, 4, 0], sizes = [2, 1, 128], strides = [1, 1, 1]} : vector<2x8x128xf32> to vector<2x1x128xf32>
    %38 = vector.shape_cast %37 : vector<2x1x128xf32> to vector<2x128xf32>
    %39 = arith.addf %36, %38 : vector<2x128xf32>
    %cst_16 = arith.constant 0.000000e+00 : f32
    %40 = vector.broadcast %cst_16 : f32 to vector<2x128xf32>
    %41 = arith.maximumf %39, %40 : vector<2x128xf32>
    %42 = arith.truncf %41 : vector<2x128xf32> to vector<2x128xbf16>
    %cst_17 = arith.constant dense<0.000000e+00> : vector<2x128xf32>
    %43 = tpu.matmul %42, %9, %cst_17 {dimension_numbers = #tpu.dot_dimension_numbers<[1], [0], [0], [1], [0, 0, 1, 1], [], []>} : vector<2x128xbf16>, vector<128x128xbf16>, vector<2x128xf32> -> vector<2x128xf32>
    %44 = vector.extract_strided_slice %8 {offsets = [0, 5, 0], sizes = [2, 1, 128], strides = [1, 1, 1]} : vector<2x8x128xf32> to vector<2x1x128xf32>
    %45 = vector.shape_cast %44 : vector<2x1x128xf32> to vector<2x128xf32>
    %46 = arith.addf %43, %45 : vector<2x128xf32>
    %cst_18 = arith.constant 0.000000e+00 : f32
    %47 = vector.broadcast %cst_18 : f32 to vector<2x128xf32>
    %48 = arith.maximumf %46, %47 : vector<2x128xf32>
    %49 = arith.truncf %48 : vector<2x128xf32> to vector<2x128xbf16>
    %cst_19 = arith.constant dense<0.000000e+00> : vector<2x128xf32>
    %50 = tpu.matmul %49, %9, %cst_19 {dimension_numbers = #tpu.dot_dimension_numbers<[1], [0], [0], [1], [0, 0, 1, 1], [], []>} : vector<2x128xbf16>, vector<128x128xbf16>, vector<2x128xf32> -> vector<2x128xf32>
    %51 = vector.extract_strided_slice %8 {offsets = [0, 6, 0], sizes = [2, 1, 128], strides = [1, 1, 1]} : vector<2x8x128xf32> to vector<2x1x128xf32>
    %52 = vector.shape_cast %51 : vector<2x1x128xf32> to vector<2x128xf32>
    %53 = arith.addf %50, %52 : vector<2x128xf32>
    %cst_20 = arith.constant 0.000000e+00 : f32
    %54 = vector.broadcast %cst_20 : f32 to vector<2x128xf32>
    %55 = arith.maximumf %53, %54 : vector<2x128xf32>
    %56 = arith.truncf %55 : vector<2x128xf32> to vector<2x128xbf16>
    %cst_21 = arith.constant dense<0.000000e+00> : vector<2x128xf32>
    %57 = tpu.matmul %56, %9, %cst_21 {dimension_numbers = #tpu.dot_dimension_numbers<[1], [0], [0], [1], [0, 0, 1, 1], [], []>} : vector<2x128xbf16>, vector<128x128xbf16>, vector<2x128xf32> -> vector<2x128xf32>
    %58 = vector.extract_strided_slice %8 {offsets = [0, 7, 0], sizes = [2, 1, 128], strides = [1, 1, 1]} : vector<2x8x128xf32> to vector<2x1x128xf32>
    %59 = vector.shape_cast %58 : vector<2x1x128xf32> to vector<2x128xf32>
    %60 = arith.addf %57, %59 : vector<2x128xf32>
    %cst_22 = arith.constant 0.000000e+00 : f32
    %61 = vector.broadcast %cst_22 : f32 to vector<2x128xf32>
    %62 = arith.maximumf %60, %61 : vector<2x128xf32>
    %c0_23 = arith.constant 0 : index
    %c0_24 = arith.constant 0 : index
    %63 = vector.load %arg4[%c0_23, %c0_24] : memref<128x10xf32, #tpu.memory_space<vmem>>, vector<128x10xf32>
    %cst_25 = arith.constant dense<0.000000e+00> : vector<2x10xf32>
    %64 = tpu.matmul %62, %63, %cst_25 {dimension_numbers = #tpu.dot_dimension_numbers<[1], [0], [0], [1], [0, 0, 1, 1], [], []>} : vector<2x128xf32>, vector<128x10xf32>, vector<2x10xf32> -> vector<2x10xf32>
    %c0_26 = arith.constant 0 : index
    %c0_27 = arith.constant 0 : index
    %65 = vector.load %arg5[%c0_26, %c0_27] : memref<1x10xf32, #tpu.memory_space<vmem>>, vector<1x10xf32>
    %66 = vector.broadcast %65 : vector<1x10xf32> to vector<2x10xf32>
    %67 = arith.addf %64, %66 : vector<2x10xf32>
    %c0_28 = arith.constant 0 : index
    %c0_29 = arith.constant 0 : index
    %68 = vector.load %arg6[%c0_28, %c0_29] : memref<2x10xf32, #tpu.memory_space<vmem>>, vector<2x10xf32>
    tpu.vector_store %arg6[%c0_28, %c0_29], %67 {strides = array<i32>} : memref<2x10xf32, #tpu.memory_space<vmem>>, vector<2x10xf32>,
    return
  }
}

</mosaic_0001>

<bundles_post_ra>
// kernel: tpu_custom_call.1
= control target key start
LH: loop header
LB: loop body
LE: loop exit
PB: predicated region body
PF: predicated region fallthrough
CT: control target
= control target key end

     0   :  { %vm37_vm0 = vcmask 1043456   ;;  %s577_s0 = inlined_call_operand.vmem [shape: f32[2,8,28], index: 0, kind: input, shape index: {}]   ;;  %s578_s1 = inlined_call_operand.vmem [shape: f32[28,128], index: 1, kind: input, shape index: {}]   ;;  %s579_s2 = inlined_call_operand.vmem [shape: bf16[128,128], index: 2, kind: input, shape index: {}]   ;;  %s580_s3 = inlined_call_operand.vmem [shape: f32[1,128], index: 3, kind: input, shape index: {}]   ;;  %s581_s4 = inlined_call_operand.vmem [shape: f32[128,10], index: 4, kind: input, shape index: {}]   ;;  %s582_s5 = inlined_call_operand.vmem [shape: f32[1,10], index: 5, kind: input, shape index: {}]   ;;  %s583_s6 = inlined_call_operand.hbm [shape: f32[2,10], index: 6, kind: output, shape index: {}]  }
   0x1   :  { %v29_v0 = vld [vmem:[%s578_s1 + $0x18] sm:$0xf]  ;;  %v28_v1 = vld [vmem:[%s578_s1 + $0x10] sm:$0xff]  ;;  %v27_v2 = vld [vmem:[%s578_s1 + $0x8] sm:$0xff] }
   0x2   :  { %338 = vmatpush.msk.msra.mxu0 %vm37_vm0, %v29_v0  ;;  %v380_v3 = vld [vmem:[%s579_s2 + $0x38] sm:$0xff] }
   0x4   :  { %54 = vmatpush.msra.mxu0 %v28_v1 }
   0x5   :  { %11 = vsyncpa [#allocation3], 0  ;;  %v26_v4 = vld [vmem:[%s578_s1] sm:$0xff]  ;;  %152 = vmatpush.bf16.msra.mxu1 %v380_v3  ;;  %v379_v5 = vld [vmem:[%s579_s2 + $0x30] sm:$0xff]  ;;  %171 = vmatpush.bf16.msra.mxu2 %v380_v3  ;;  %vm30_vm1 = vcmask 228352   ;;  %vm95_vm2 = vcmask 1041409  }
   0x6   :  { %55 = vmatpush.msra.mxu0 %v27_v2  ;;  %v24_v6 = vld [vmem:[%s577_s0] sm:$0xff]  ;;  %190 = vmatpush.bf16.msra.mxu3 %v380_v3  ;;  %v378_v7 = vld [vmem:[%s579_s2 + $0x28] sm:$0xff]  ;;  %v376_v10 = vld [vmem:[%s579_s2 + $0x18] sm:$0xff]  ;;  %s410_s29 = smov [#allocation2]   ;;  %s329_s9 = sshll.u32 %s583_s6, 4  ;;  %vm320_vm3 = vcmask 74752   ;;  %s330_s9 = int_to_ptr.hbm [resolvable:$true] %s329_s9 }
   0x7   :  { %v25_v8 = vld [vmem:[%s577_s0 + $0x8] sm:$0xff]  ;;  %v377_v9 = vld [vmem:[%s579_s2 + $0x20] sm:$0xff]  ;;  %v375_v11 = vld [vmem:[%s579_s2 + $0x10] sm:$0xff]  ;;  %s327_s30 = sshll.u32 %s410_s29, 4  ;;  %s328_s30 = int_to_ptr.vmem [resolvable:$true] %s327_s30 }
   0x8   :  { %56 = vmatpush.msra.mxu0 %v26_v4  ;;  %v485_v12 = vld [vmem:[%s579_s2 + $0x8] sm:$0xff]  ;;  %v491_v13 = vld [vmem:[%s579_s2] sm:$0xff] }
   0x9   :  { %339 = vmatmul.msk.f32.vlgmr.msra.gmra.mxu0 %vm30_vm1, %v24_v6  ;;  %153 = vmatpush.bf16.msra.mxu1 %v379_v5  ;;  %v382_v14 = vld [vmem:[%s580_s3] ss:$0 sm:$0xff] }
   0xa   :  { %172 = vmatpush.bf16.msra.mxu2 %v379_v5  ;;  %191 = vmatpush.bf16.msra.mxu3 %v379_v5 }
   0xb   :  { %209 = vmatpush.bf16.msrb.mxu0 %v380_v3 }
   0xd   :  { %154 = vmatpush.bf16.msra.mxu1 %v378_v7 }
   0xe   :  { %173 = vmatpush.bf16.msra.mxu2 %v378_v7  ;;  %192 = vmatpush.bf16.msra.mxu3 %v378_v7 }
   0xf   :  { %210 = vmatpush.bf16.msrb.mxu0 %v379_v5 }
  0x11   :  { %340 = vmatmul.msk.f32.gmra.mxu0 %vm30_vm1, %v25_v8  ;;  %155 = vmatpush.bf16.msra.mxu1 %v377_v9 }
  0x12   :  { %174 = vmatpush.bf16.msra.mxu2 %v377_v9  ;;  %193 = vmatpush.bf16.msra.mxu3 %v377_v9 }
  0x13   :  { %211 = vmatpush.bf16.msrb.mxu0 %v378_v7 }
  0x15   :  { %156 = vmatpush.bf16.msra.mxu1 %v376_v10 }
  0x16   :  { %175 = vmatpush.bf16.msra.mxu2 %v376_v10  ;;  %194 = vmatpush.bf16.msra.mxu3 %v376_v10 }
  0x17   :  { %212 = vmatpush.bf16.msrb.mxu0 %v377_v9 }
  0x19   :  { %157 = vmatpush.bf16.msra.mxu1 %v375_v11 }
  0x1a   :  { %176 = vmatpush.bf16.msra.mxu2 %v375_v11  ;;  %195 = vmatpush.bf16.msra.mxu3 %v375_v11 }
  0x1b   :  { %213 = vmatpush.bf16.msrb.mxu0 %v376_v10 }
  0x1d   :  { %158 = vmatpush.bf16.msra.mxu1 %v485_v12 }
  0x1e   :  { %177 = vmatpush.bf16.msra.mxu2 %v485_v12  ;;  %196 = vmatpush.bf16.msra.mxu3 %v485_v12 }
  0x1f   :  { %214 = vmatpush.bf16.msrb.mxu0 %v375_v11 }
  0x21   :  { %159 = vmatpush.bf16.msra.mxu1 %v491_v13 }
  0x22   :  { %178 = vmatpush.bf16.msra.mxu2 %v491_v13  ;;  %197 = vmatpush.bf16.msra.mxu3 %v491_v13 }
  0x23   :  { %215 = vmatpush.bf16.msrb.mxu0 %v485_v12 }
  0x25   :  { %228 = vmatpush.bf16.msrb.mxu1 %v380_v3 }
  0x26   :  { %247 = vmatpush.bf16.msrb.mxu2 %v380_v3  ;;  %266 = vmatpush.bf16.msrb.mxu3 %v380_v3 }
  0x27   :  { %216 = vmatpush.bf16.msrb.mxu0 %v491_v13 }
  0x29   :  { %229 = vmatpush.bf16.msrb.mxu1 %v379_v5 }
  0x2a   :  { %248 = vmatpush.bf16.msrb.mxu2 %v379_v5  ;;  %267 = vmatpush.bf16.msrb.mxu3 %v379_v5 }
  0x2d   :  { %230 = vmatpush.bf16.msrb.mxu1 %v378_v7 }
  0x2e   :  { %249 = vmatpush.bf16.msrb.mxu2 %v378_v7  ;;  %268 = vmatpush.bf16.msrb.mxu3 %v378_v7 }
  0x31   :  { %231 = vmatpush.bf16.msrb.mxu1 %v377_v9 }
  0x32   :  { %250 = vmatpush.bf16.msrb.mxu2 %v377_v9  ;;  %269 = vmatpush.bf16.msrb.mxu3 %v377_v9  ;;  %v295_v9 = vld [vmem:[%s581_s4 + $0x78] sm:$0xff] }
  0x33   :  { %300 = vmatpush.msra.mxu0 %v295_v9 }
  0x35   :  { %232 = vmatpush.bf16.msrb.mxu1 %v376_v10 }
  0x36   :  { %251 = vmatpush.bf16.msrb.mxu2 %v376_v10  ;;  %270 = vmatpush.bf16.msrb.mxu3 %v376_v10  ;;  %v294_v10 = vld [vmem:[%s581_s4 + $0x70] sm:$0xff] }
  0x37   :  { %301 = vmatpush.msra.mxu0 %v294_v10 }
  0x39   :  { %233 = vmatpush.bf16.msrb.mxu1 %v375_v11 }
  0x3a   :  { %252 = vmatpush.bf16.msrb.mxu2 %v375_v11  ;;  %271 = vmatpush.bf16.msrb.mxu3 %v375_v11  ;;  %v293_v11 = vld [vmem:[%s581_s4 + $0x68] sm:$0xff] }
  0x3b   :  { %302 = vmatpush.msra.mxu0 %v293_v11 }
  0x3d   :  { %234 = vmatpush.bf16.msrb.mxu1 %v485_v12 }
  0x3e   :  { %253 = vmatpush.bf16.msrb.mxu2 %v485_v12  ;;  %272 = vmatpush.bf16.msrb.mxu3 %v485_v12  ;;  %v292_v12 = vld [vmem:[%s581_s4 + $0x60] sm:$0xff] }
  0x3f   :  { %303 = vmatpush.msra.mxu0 %v292_v12 }
  0x41   :  { %235 = vmatpush.bf16.msrb.mxu1 %v491_v13 }
  0x42   :  { %254 = vmatpush.bf16.msrb.mxu2 %v491_v13  ;;  %273 = vmatpush.bf16.msrb.mxu3 %v491_v13  ;;  %v291_v13 = vld [vmem:[%s581_s4 + $0x58] sm:$0xff] }
  0x43   :  { %304 = vmatpush.msra.mxu0 %v291_v13 }
  0x86   :  { %v58_v15 = vpop.f32.mrf.mxu0 }
  0x87   :  { %v68_v16 = vadd.f32 %v382_v14, %v58_v15  ;;  %v289_v15 = vld [vmem:[%s581_s4 + $0x48] sm:$0xff] }
  0x89   :  { %v86_v17 = vmax.f32 %v68_v16, 0.0  ;;  %v149_v19 = vrot.slane %v68_v16, 1  ;;  %v167_v21 = vrot.slane %v68_v16, 2  ;;  %v186_v22 = vrot.slane %v68_v16, 3 }
  0x8a   :  { %v205_v23 = vrot.slane %v68_v16, 4  ;;  %v224_v25 = vrot.slane %v68_v16, 5  ;;  %v243_v26 = vrot.slane %v68_v16, 6  ;;  %v262_v27 = vrot.slane %v68_v16, 7  ;;  %v288_v16 = vld [vmem:[%s581_s4 + $0x40] sm:$0xff] }
  0x8b   :  { %v88_v24 = vpack.c.bf16 %v86_v17, %v86_v17  ;;  %v287_v17 = vld [vmem:[%s581_s4 + $0x38] sm:$0xff] }
  0x8d   :  { %v92_v44 = vunpack.c.l.b16 %v88_v24 }
  0x8e   :  { %v61_v18 = vpop.f32.mrf.mxu0 }
  0x8f   :  { %v69_v20 = vadd.f32 %v382_v14, %v61_v18  ;;  %v290_v14 = vld [vmem:[%s581_s4 + $0x50] sm:$0xff] }
  0x90   :  { %305 = vmatpush.msra.mxu0 %v290_v14  ;;  %v286_v18 = vld [vmem:[%s581_s4 + $0x30] sm:$0xff] }
  0x91   :  { %v87_v28 = vmax.f32 %v69_v20, 0.0  ;;  %v150_v29 = vsel %vm95_vm2, %v69_v20, %v149_v19  ;;  %v168_v30 = vrot.slane %v69_v20, 1  ;;  %v187_v31 = vrot.slane %v69_v20, 2  ;;  %v285_v19 = vld [vmem:[%s581_s4 + $0x28] sm:$0xff] }
  0x92   :  { %v206_v32 = vrot.slane %v69_v20, 3  ;;  %v225_v33 = vrot.slane %v69_v20, 4  ;;  %v244_v34 = vrot.slane %v69_v20, 5  ;;  %v263_v35 = vrot.slane %v69_v20, 6  ;;  %306 = vmatpush.msra.mxu0 %v289_v15  ;;  %v284_v20 = vld [vmem:[%s581_s4 + $0x20] sm:$0xff] }
  0x93   :  { %v89_v36 = vpack.c.bf16 %v87_v28, %v87_v28  ;;  %v169_v37 = vsel %vm95_vm2, %v168_v30, %v167_v21  ;;  %v188_v38 = vsel %vm95_vm2, %v187_v31, %v186_v22  ;;  %v283_v21 = vld [vmem:[%s581_s4 + $0x18] sm:$0xff]  ;;  %v281_v28 = vld [vmem:[%s581_s4 + $0x8] sm:$0xff] }
  0x94   :  { %v207_v39 = vsel %vm95_vm2, %v206_v32, %v205_v23  ;;  %v226_v40 = vsel %vm95_vm2, %v225_v33, %v224_v25  ;;  %v511_v41 = vsel %vm95_vm2, %v244_v34, %v243_v26  ;;  %v515_v42 = vsel %vm95_vm2, %v263_v35, %v262_v27  ;;  %307 = vmatpush.msra.mxu0 %v288_v16  ;;  %v282_v27 = vld [vmem:[%s581_s4 + $0x10] sm:$0xff]  ;;  %v383_v34 = vld [vmem:[%s582_s5] ss:$0 sm:$0xff] }
  0x95   :  { %v93_v43 = vunpack.c.l.b16 %v89_v36 }
  0x96   :  { %308 = vmatpush.msra.mxu0 %v287_v17 }
  0x97   :  { %v94_v45 = vrot.slane %v93_v43, 7 }
  0x98   :  { %309 = vmatpush.msra.mxu0 %v286_v18 }
  0x99   :  { %v96_v46 = vsel %vm95_vm2, %v94_v45, %v92_v44 }
  0x9a   :  { %v97_v47 = vpack.c.b16 %v96_v46, %v96_v46  ;;  %310 = vmatpush.msra.mxu0 %v285_v19 }
  0x9c   :  { %160 = vmatmul.bf16.vlgmr.msra.gmra.mxu1 %v97_v47  ;;  %311 = vmatpush.msra.mxu0 %v284_v20 }
  0x9e   :  { %312 = vmatpush.msra.mxu0 %v283_v21 }
  0xa0   :  { %313 = vmatpush.msra.mxu0 %v282_v27 }
  0xa2   :  { %314 = vmatpush.msra.mxu0 %v281_v28 }
 0x119   :  { %v161_v48 = vpop.f32.mrf.mxu1 }
 0x11a   :  { %v162_v49 = vadd.f32 %v161_v48, %v150_v29  ;;  %v280_v29 = vld [vmem:[%s581_s4] sm:$0xff] }
 0x11b   :  { %315 = vmatpush.msra.mxu0 %v280_v29 }
 0x11c   :  { %v165_v50 = vmax.f32 %v162_v49, 0.0 }
 0x11e   :  { %v166_v51 = vpack.c.bf16 %v165_v50, %v165_v50 }
 0x120   :  { %179 = vmatmul.bf16.vlgmr.msra.gmra.mxu2 %v166_v51 }
 0x121   :  { %v163_v52 = vpop.f32.mrf.mxu1 }
 0x1a3   :  { %v180_v53 = vpop.f32.mrf.mxu2 }
 0x1a4   :  { %v181_v54 = vadd.f32 %v180_v53, %v169_v37 }
 0x1a6   :  { %v184_v55 = vmax.f32 %v181_v54, 0.0 }
 0x1a8   :  { %v185_v56 = vpack.c.bf16 %v184_v55, %v184_v55 }
 0x1aa   :  { %198 = vmatmul.bf16.vlgmr.msra.gmra.mxu3 %v185_v56 }
 0x1ab   :  { %v182_v57 = vpop.f32.mrf.mxu2 }
 0x22d   :  { %v199_v58 = vpop.f32.mrf.mxu3 }
 0x22e   :  { %v200_v59 = vadd.f32 %v199_v58, %v188_v38 }
 0x230   :  { %v203_v60 = vmax.f32 %v200_v59, 0.0 }
 0x232   :  { %v204_v61 = vpack.c.bf16 %v203_v60, %v203_v60 }
 0x234   :  { %217 = vmatmul.bf16.vlgmr.msrb.gmra.mxu0 %v204_v61 }
 0x235   :  { %v201_v62 = vpop.f32.mrf.mxu3 }
 0x2b1   :  { %v218_v63 = vpop.f32.mrf.mxu0 }
 0x2b2   :  { %v219_v0 = vadd.f32 %v218_v63, %v207_v39 }
 0x2b4   :  { %v222_v1 = vmax.f32 %v219_v0, 0.0 }
 0x2b6   :  { %v223_v2 = vpack.c.bf16 %v222_v1, %v222_v1 }
 0x2b8   :  { %236 = vmatmul.bf16.vlgmr.msrb.gmra.mxu1 %v223_v2 }
 0x2b9   :  { %v220_v3 = vpop.f32.mrf.mxu0 }
 0x335   :  { %v237_v4 = vpop.f32.mrf.mxu1 }
 0x336   :  { %v238_v5 = vadd.f32 %v237_v4, %v226_v40 }
 0x338   :  { %v241_v6 = vmax.f32 %v238_v5, 0.0 }
 0x33a   :  { %v242_v7 = vpack.c.bf16 %v241_v6, %v241_v6 }
 0x33c   :  { %255 = vmatmul.bf16.vlgmr.msrb.gmra.mxu2 %v242_v7 }
 0x33d   :  { %v239_v8 = vpop.f32.mrf.mxu1 }
 0x3bf   :  { %v256_v22 = vpop.f32.mrf.mxu2 }
 0x3c0   :  { %v257_v23 = vadd.f32 %v256_v22, %v511_v41 }
 0x3c2   :  { %v260_v24 = vmax.f32 %v257_v23, 0.0 }
 0x3c4   :  { %v261_v25 = vpack.c.bf16 %v260_v24, %v260_v24 }
 0x3c6   :  { %274 = vmatmul.bf16.vlgmr.msrb.gmra.mxu3 %v261_v25 }
 0x3c7   :  { %v258_v26 = vpop.f32.mrf.mxu2 }
 0x449   :  { %v275_v30 = vpop.f32.mrf.mxu3 }
 0x44a   :  { %v276_v31 = vadd.f32 %v275_v30, %v515_v42 }
 0x44c   :  { %v279_v32 = vmax.f32 %v276_v31, 0.0 }
 0x44e   :  { %316 = vmatmul.f32.vlgmr.msra.gmra.mxu0 %v279_v32 }
 0x451   :  { %v277_v33 = vpop.f32.mrf.mxu3 }
 0x4cb   :  { %v317_v35 = vpop.f32.mrf.mxu0 }
 0x4cc   :  { %v318_v36 = vadd.f32 %v383_v34, %v317_v35 }
 0x4ce   :  { %321 = vst.msk [vmem:[#allocation2] sm:$0x3] %vm320_vm3, %v318_v36 }
 0x4cf   :  { %332 = dma.vmem_to_hbm [thread:$0]  %s328_s30, 32, %s330_s9, [#allocation3]  }
 0x4d0   :  { %408 = dma.done.wait [#allocation3], 32  }
 0x4d1   :  { %409 = vsyncadd [#allocation3], 4294967264 }
 0x4d2   :  { %337 = vsyncpa [#allocation3], 1 }

</bundles_post_ra>
